<compile_context>
chip_gen: v7x
topology: tpu7x:2x2x1
jax: 0.10.0
libtpu: 0.0.40
codegen_flags: <defaults>
</compile_context>

<pallas_src>
import functools

import jax
import jax.numpy as jnp
from jax.experimental import pallas as pl
from jax.experimental.pallas import tpu as pltpu

_LANES = 128
_MAX_TILE_ROWS = 2048   # 2048*128*4B = 1 MiB per f32 stream block (per buffer)
_OUT_ROWS = 8           # one full (8,128) output block per core split


def _round_up(a, m):
    return -(-a // m) * m


def _elbo_kernel(x_ref, xh_ref, mu_ref, sg_ref, out_ref, acc_ref, *,
                 n_blocks, steps, valid_last, needs_mask, has_oob,
                 inv_n_x, inv_n_mu, scale):
    p = pl.program_id(0)          # core split ("parallel")
    i = pl.program_id(1)          # reduction step ("arbitrary")
    gb = p * steps + i            # global block index (small -> int32 safe)

    @pl.when(i == 0)
    def _():
        acc_ref[...] = jnp.zeros_like(acc_ref)

    def accumulate(apply_tail_mask):
        x = x_ref[...].astype(jnp.float32)
        xh = xh_ref[...].astype(jnp.float32)
        # x*log(xh) + (1-x)*log(1-xh)  ==  log1m + x*(log(xh) - log1m)
        log1m = jnp.log(1.0 - xh)
        terms = log1m + x * (jnp.log(xh) - log1m)
        if apply_tail_mask:
            # Block-local element index (< tile_rows*128 <= 2^18 -> no overflow).
            row = jax.lax.broadcasted_iota(jnp.int32, terms.shape, 0)
            lane = jax.lax.broadcasted_iota(jnp.int32, terms.shape, 1)
            local = row * _LANES + lane
            # NOTE: must stay a select (jnp.where) - the invalid tail may hold
            # garbage / padded values whose log() is NaN/-inf; a multiplicative
            # mask would propagate it.
            terms = jnp.where(local < valid_last, terms, 0.0)
        # Per-lane partial sums (sublane reduce only) accumulated across steps.
        acc_ref[...] += jnp.sum(terms, axis=0, keepdims=True)

    if needs_mask:
        @pl.when(gb == n_blocks - 1)
        def _():
            accumulate(True)

        @pl.when(gb < n_blocks - 1)
        def _():
            accumulate(False)
    elif has_oob:
        @pl.when(gb < n_blocks)      # skip the duplicated (clamped) OOB block
        def _():
            accumulate(False)
    else:
        accumulate(False)

    @pl.when(i == steps - 1)
    def _():
        # Cross-lane reduce of this split's partial log-likelihood.
        # TODO(synk): a single f32 accumulator starts losing precision beyond
        # ~1e10 elements; add a second accumulation level if used at that scale.
        ll_p = jnp.sum(acc_ref[...]) * (inv_n_x * scale)

        # KL: 0.5*mean(mu^2 + sigma^2 - log(sigma^2) - 1)*scale
        # (tiny resident block, padded with mu=0/sigma=1 -> exact zero terms).
        # Only split 0 contributes KL so the wrapper-side sum stays correct.
        mu = mu_ref[...]
        sg = sg_ref[...]
        s2 = sg * sg
        kl_full = (0.5 * jnp.sum(mu * mu + s2 - jnp.log(s2) - 1.0)
                   * (inv_n_mu * scale))
        kl_p = jnp.where(p == 0, kl_full, 0.0)

        lane = jax.lax.broadcasted_iota(jnp.int32, (_OUT_ROWS, _LANES), 1)
        out_ref[...] = jnp.where(lane == 0, ll_p - kl_p,
                       jnp.where(lane == 1, ll_p,
                       jnp.where(lane == 2, kl_p, 0.0)))


def elbo_pallas(x, x_hat, mu, sigma, scale=1.0):
    # ---- log-likelihood streams: native dtype, lane-dense (rows, 128) ------
    def _as_stream(a):
        a = jnp.asarray(a)
        if a.dtype not in (jnp.float32, jnp.bfloat16):
            a = a.astype(jnp.float32)
        return a.reshape(-1)

    x_flat = _as_stream(x)
    xh_flat = _as_stream(x_hat)
    n_x = int(x_flat.shape[0])

    rows = -(-n_x // _LANES)                       # ceil(n / 128)
    if rows * _LANES != n_x:
        # Ragged tail (< one 128-lane row).  Only path that copies the streams;
        # padded slots are discarded by the in-kernel tail mask.
        pad = rows * _LANES - n_x
        x_flat = jnp.pad(x_flat, (0, pad))
        xh_flat = jnp.pad(xh_flat, (0, pad), constant_values=0.5)
    x2d = x_flat.reshape(rows, _LANES)             # copy-free when aligned
    xh2d = xh_flat.reshape(rows, _LANES)

    tile_rows = min(_MAX_TILE_ROWS, _round_up(rows, 16))   # 16: bf16 min tile
    n_blocks = -(-rows // tile_rows)
    n_splits = 2 if n_blocks >= 2 else 1           # megacore sharding on v7x
    steps = -(-n_blocks // n_splits)
    has_oob = n_splits * steps != n_blocks

    block_elems = tile_rows * _LANES
    valid_last = n_x - (n_blocks - 1) * block_elems        # static, > 0
    needs_mask = valid_last != block_elems

    # ---- KL inputs (tiny): pad with mu=0, sigma=1 -> zero KL contribution --
    mu_flat = jnp.asarray(mu, jnp.float32).reshape(-1)
    sg_flat = jnp.asarray(sigma, jnp.float32).reshape(-1)
    n_mu = int(mu_flat.shape[0])
    mu_rows = max(8, _round_up(-(-n_mu // _LANES), 8))
    mu_total = mu_rows * _LANES
    mu2d = jnp.pad(mu_flat, (0, mu_total - n_mu)).reshape(mu_rows, _LANES)
    sg2d = jnp.pad(sg_flat, (0, mu_total - n_mu),
                   constant_values=1.0).reshape(mu_rows, _LANES)

    kernel = functools.partial(
        _elbo_kernel,
        n_blocks=int(n_blocks), steps=int(steps),
        valid_last=int(valid_last),
        needs_mask=bool(needs_mask), has_oob=bool(has_oob),
        inv_n_x=1.0 / float(n_x), inv_n_mu=1.0 / float(n_mu),
        scale=float(scale),
    )

    def stream_map(p, i):
        # Clamp so the (possible) single extra step of split 1 stays in bounds;
        # its contribution is skipped in-kernel.
        return (jnp.minimum(p * steps + i, n_blocks - 1), 0)

    cost = pl.CostEstimate(
        flops=5 * n_x + 6 * n_mu,
        transcendentals=2 * n_x + n_mu,
        bytes_accessed=int((x2d.dtype.itemsize + xh2d.dtype.itemsize)
                           * rows * _LANES
                           + 8 * mu_total
                           + 4 * n_splits * _OUT_ROWS * _LANES),
    )

    out = pl.pallas_call(
        kernel,
        out_shape=jax.ShapeDtypeStruct((n_splits * _OUT_ROWS, _LANES),
                                       jnp.float32),
        grid=(n_splits, steps),
        in_specs=[
            pl.BlockSpec((tile_rows, _LANES), stream_map),
            pl.BlockSpec((tile_rows, _LANES), stream_map),
            pl.BlockSpec((mu_rows, _LANES), lambda p, i: (0, 0)),   # resident
            pl.BlockSpec((mu_rows, _LANES), lambda p, i: (0, 0)),   # resident
        ],
        out_specs=pl.BlockSpec((_OUT_ROWS, _LANES), lambda p, i: (p, 0)),
        scratch_shapes=[pltpu.VMEM((1, _LANES), jnp.float32)],
        compiler_params=pltpu.CompilerParams(
            dimension_semantics=("parallel", "arbitrary")),
        cost_estimate=cost,
    )(x2d, xh2d, mu2d, sg2d)

    # Combine the (at most two) per-split partials; KL only lives in split 0.
    packed = out.reshape(n_splits, _OUT_ROWS, _LANES)[:, 0, :3].sum(axis=0)
    return packed[0], packed[1], packed[2]


def elbo_reference(x, x_hat, mu, sigma, scale=1.0):
    ll = jnp.mean(x * jnp.log(x_hat) + (1.0 - x) * jnp.log(1.0 - x_hat)) * scale
    kl = 0.5 * jnp.mean(mu * mu + sigma * sigma
                        - jnp.log(sigma * sigma) - 1.0) * scale
    return ll - kl, ll, kl


if __name__ == "__main__":
    key = jax.random.PRNGKey(0)
    k1, k2, k3, k4 = jax.random.split(key, 4)

    B, C, H, W = 2, 4, 16, 16
    D = 32

    x = jax.random.uniform(k1, (B, C, H, W), jnp.float32)            # targets in [0,1]
    x_hat = jax.random.uniform(k2, (B, C, H, W), jnp.float32,
                               minval=0.05, maxval=0.95)             # probs in (0,1)
    mu = jax.random.normal(k3, (B, D), jnp.float32)
    sigma = jax.random.uniform(k4, (B, D), jnp.float32,
                               minval=0.5, maxval=1.5)

    scale = 1.0
    elbo, ll, kl = jax.block_until_ready(
        jax.jit(lambda *a: elbo_pallas(*a, scale=scale))(x, x_hat, mu, sigma))

    elbo_ref, ll_ref, kl_ref = elbo_reference(x, x_hat, mu, sigma, scale)

    assert jnp.allclose(ll, ll_ref, rtol=1e-5, atol=1e-5), (ll, ll_ref)
    assert jnp.allclose(kl, kl_ref, rtol=1e-5, atol=1e-5), (kl, kl_ref)
    assert jnp.allclose(elbo, elbo_ref, rtol=1e-5, atol=1e-5), (elbo, elbo_ref)

    print("KERNEL_OK")
</pallas_src>

<mosaic_0001>
module attributes {stable_mosaic.version = 11 : i64} {
  func.func @_elbo_kernel(%arg0: i32, %arg1: i32, %arg2: memref<16x128xf32, #tpu.memory_space<vmem>>, %arg3: memref<16x128xf32, #tpu.memory_space<vmem>>, %arg4: memref<8x128xf32, #tpu.memory_space<vmem>>, %arg5: memref<8x128xf32, #tpu.memory_space<vmem>>, %arg6: memref<8x128xf32, #tpu.memory_space<vmem>>, %arg7: memref<1x128xf32, #tpu.memory_space<vmem>>) attributes {dimension_semantics = [#tpu.dimension_semantics<parallel>, #tpu.dimension_semantics<arbitrary>], iteration_bounds = array<i64: 1, 1>, scalar_prefetch = 0 : i64, scratch_operands = 1 : i64, tpu.core_type = #tpu.core_type<tc>, window_params = [{transform_indices = @transform_0, window_bounds = array<i64: 16, 128>}, {transform_indices = @transform_1, window_bounds = array<i64: 16, 128>}, {pipeline_mode = #tpu.pipeline_mode<synchronous>, transform_indices = @transform_2, window_bounds = array<i64: 8, 128>}, {pipeline_mode = #tpu.pipeline_mode<synchronous>, transform_indices = @transform_3, window_bounds = array<i64: 8, 128>}, {transform_indices = @transform_4, window_bounds = array<i64: 8, 128>}]} {
    %c0_i32 = arith.constant 0 : i32
    %0 = arith.cmpi eq, %arg1, %c0_i32 : i32
    %1 = arith.extui %0 : i1 to i32
    %c0_i32_0 = arith.constant 0 : i32
    %2 = arith.cmpi ne, %1, %c0_i32_0 : i32
    scf.if %2 {
      %cst_11 = arith.constant 0.000000e+00 : f32
      %20 = vector.broadcast %cst_11 : f32 to vector<1x128xf32>
      %c0_12 = arith.constant 0 : index
      %c0_13 = arith.constant 0 : index
      %21 = vector.load %arg7[%c0_12, %c0_13] : memref<1x128xf32, #tpu.memory_space<vmem>>, vector<1x128xf32>
      tpu.vector_store %arg7[%c0_12, %c0_13], %20 {strides = array<i32>} : memref<1x128xf32, #tpu.memory_space<vmem>>, vector<1x128xf32>,
    } else {
    }
    %c0 = arith.constant 0 : index
    %c0_1 = arith.constant 0 : index
    %3 = vector.load %arg2[%c0, %c0_1] : memref<16x128xf32, #tpu.memory_space<vmem>>, vector<16x128xf32>
    %c0_2 = arith.constant 0 : index
    %c0_3 = arith.constant 0 : index
    %4 = vector.load %arg3[%c0_2, %c0_3] : memref<16x128xf32, #tpu.memory_space<vmem>>, vector<16x128xf32>
    %cst = arith.constant 1.000000e+00 : f32
    %5 = vector.broadcast %cst : f32 to vector<16x128xf32>
    %6 = arith.subf %5, %4 : vector<16x128xf32>
    %7 = math.log %6 : vector<16x128xf32>
    %8 = math.log %4 : vector<16x128xf32>
    %9 = arith.subf %8, %7 : vector<16x128xf32>
    %10 = arith.mulf %3, %9 : vector<16x128xf32>
    %11 = arith.addf %7, %10 : vector<16x128xf32>
    %c0_4 = arith.constant 0 : index
    %c0_5 = arith.constant 0 : index
    %12 = vector.load %arg7[%c0_4, %c0_5] : memref<1x128xf32, #tpu.memory_space<vmem>>, vector<1x128xf32>
    %cst_6 = arith.constant dense<0.000000e+00> : vector<128xf32>
    %13 = vector.multi_reduction <add>, %11, %cst_6 [0] : vector<16x128xf32> to vector<128xf32>
    %14 = vector.shape_cast %13 : vector<128xf32> to vector<1x128xf32>
    %15 = arith.addf %12, %14 : vector<1x128xf32>
    %c0_7 = arith.constant 0 : index
    %c0_8 = arith.constant 0 : index
    %16 = vector.load %arg7[%c0_7, %c0_8] : memref<1x128xf32, #tpu.memory_space<vmem>>, vector<1x128xf32>
    tpu.vector_store %arg7[%c0_7, %c0_8], %15 {strides = array<i32>} : memref<1x128xf32, #tpu.memory_space<vmem>>, vector<1x128xf32>,
    %c0_i32_9 = arith.constant 0 : i32
    %17 = arith.cmpi eq, %arg1, %c0_i32_9 : i32
    %18 = arith.extui %17 : i1 to i32
    %c0_i32_10 = arith.constant 0 : i32
    %19 = arith.cmpi ne, %18, %c0_i32_10 : i32
    scf.if %19 {
      %c0_11 = arith.constant 0 : index
      %c0_12 = arith.constant 0 : index
      %20 = vector.load %arg7[%c0_11, %c0_12] : memref<1x128xf32, #tpu.memory_space<vmem>>, vector<1x128xf32>
      %21 = vector.shape_cast %20 : vector<1x128xf32> to vector<1x1x128xf32>
      %cst_13 = arith.constant dense<0.000000e+00> : vector<1xf32>
      %22 = vector.multi_reduction <add>, %21, %cst_13 [1, 2] : vector<1x1x128xf32> to vector<1xf32>
      %23 = vector.shape_cast %22 : vector<1xf32> to vector<1x1x1xf32>
      %24 = vector.extract %23[0, 0, 0] : f32 from vector<1x1x1xf32>
      %cst_14 = arith.constant 4.8828125E-4 : f32
      %25 = arith.mulf %24, %cst_14 : f32
      %c0_15 = arith.constant 0 : index
      %c0_16 = arith.constant 0 : index
      %26 = vector.load %arg4[%c0_15, %c0_16] : memref<8x128xf32, #tpu.memory_space<vmem>>, vector<8x128xf32>
      %c0_17 = arith.constant 0 : index
      %c0_18 = arith.constant 0 : index
      %27 = vector.load %arg5[%c0_17, %c0_18] : memref<8x128xf32, #tpu.memory_space<vmem>>, vector<8x128xf32>
      %28 = arith.mulf %27, %27 : vector<8x128xf32>
      %29 = arith.mulf %26, %26 : vector<8x128xf32>
      %30 = arith.addf %29, %28 : vector<8x128xf32>
      %31 = math.log %28 : vector<8x128xf32>
      %32 = arith.subf %30, %31 : vector<8x128xf32>
      %cst_19 = arith.constant 1.000000e+00 : f32
      %33 = vector.broadcast %cst_19 : f32 to vector<8x128xf32>
      %34 = arith.subf %32, %33 : vector<8x128xf32>
      %35 = vector.shape_cast %34 : vector<8x128xf32> to vector<1x8x128xf32>
      %cst_20 = arith.constant dense<0.000000e+00> : vector<1xf32>
      %36 = vector.multi_reduction <add>, %35, %cst_20 [1, 2] : vector<1x8x128xf32> to vector<1xf32>
      %37 = vector.shape_cast %36 : vector<1xf32> to vector<1x1x1xf32>
      %38 = vector.extract %37[0, 0, 0] : f32 from vector<1x1x1xf32>
      %cst_21 = arith.constant 5.000000e-01 : f32
      %39 = arith.mulf %cst_21, %38 : f32
      %cst_22 = arith.constant 1.562500e-02 : f32
      %40 = arith.mulf %39, %cst_22 : f32
      %c0_i32_23 = arith.constant 0 : i32
      %41 = arith.cmpi eq, %arg0, %c0_i32_23 : i32
      %cst_24 = arith.constant 0.000000e+00 : f32
      %42 = arith.select %41, %40, %cst_24 : f32
      %43 = tpu.iota {dimensions = array<i32: 1>} : vector<8x128xi32>
      %c0_i32_25 = arith.constant 0 : i32
      %44 = vector.broadcast %c0_i32_25 : i32 to vector<8x128xi32>
      %45 = arith.cmpi eq, %43, %44 : vector<8x128xi32>
      %46 = arith.subf %25, %42 : f32
      %c1_i32 = arith.constant 1 : i32
      %47 = vector.broadcast %c1_i32 : i32 to vector<8x128xi32>
      %48 = arith.cmpi eq, %43, %47 : vector<8x128xi32>
      %c2_i32 = arith.constant 2 : i32
      %49 = vector.broadcast %c2_i32 : i32 to vector<8x128xi32>
      %50 = arith.cmpi eq, %43, %49 : vector<8x128xi32>
      %cst_26 = arith.constant 0.000000e+00 : f32
      %51 = vector.broadcast %42 : f32 to vector<8x128xf32>
      %52 = vector.broadcast %cst_26 : f32 to vector<8x128xf32>
      %53 = arith.select %50, %51, %52 : vector<8x128xi1>, vector<8x128xf32>
      %54 = vector.broadcast %25 : f32 to vector<8x128xf32>
      %55 = arith.select %48, %54, %53 : vector<8x128xi1>, vector<8x128xf32>
      %56 = vector.broadcast %46 : f32 to vector<8x128xf32>
      %57 = arith.select %45, %56, %55 : vector<8x128xi1>, vector<8x128xf32>
      %c0_27 = arith.constant 0 : index
      %c0_28 = arith.constant 0 : index
      %58 = vector.load %arg6[%c0_27, %c0_28] : memref<8x128xf32, #tpu.memory_space<vmem>>, vector<8x128xf32>
      tpu.vector_store %arg6[%c0_27, %c0_28], %57 {strides = array<i32>} : memref<8x128xf32, #tpu.memory_space<vmem>>, vector<8x128xf32>,
    } else {
    }
    return
  }
  func.func @transform_0(%arg0: i32, %arg1: i32) -> (i32, i32) {
    %c1_i32 = arith.constant 1 : i32
    %0 = arith.muli %arg0, %c1_i32 : i32
    %1 = arith.addi %0, %arg1 : i32
    %c0_i32 = arith.constant 0 : i32
    %2 = arith.minsi %1, %c0_i32 : i32
    %c0_i32_0 = arith.constant 0 : i32
    %c0_i32_1 = arith.constant 0 : i32
    return %2, %c0_i32_0 : i32, i32
  }
  func.func @transform_1(%arg0: i32, %arg1: i32) -> (i32, i32) {
    %c1_i32 = arith.constant 1 : i32
    %0 = arith.muli %arg0, %c1_i32 : i32
    %1 = arith.addi %0, %arg1 : i32
    %c0_i32 = arith.constant 0 : i32
    %2 = arith.minsi %1, %c0_i32 : i32
    %c0_i32_0 = arith.constant 0 : i32
    %c0_i32_1 = arith.constant 0 : i32
    return %2, %c0_i32_0 : i32, i32
  }
  func.func @transform_2(%arg0: i32, %arg1: i32) -> (i32, i32) {
    %c0_i32 = arith.constant 0 : i32
    %c0_i32_0 = arith.constant 0 : i32
    %c0_i32_1 = arith.constant 0 : i32
    return %c0_i32, %c0_i32_0 : i32, i32
  }
  func.func @transform_3(%arg0: i32, %arg1: i32) -> (i32, i32) {
    %c0_i32 = arith.constant 0 : i32
    %c0_i32_0 = arith.constant 0 : i32
    %c0_i32_1 = arith.constant 0 : i32
    return %c0_i32, %c0_i32_0 : i32, i32
  }
  func.func @transform_4(%arg0: i32, %arg1: i32) -> (i32, i32) {
    %c0_i32 = arith.constant 0 : i32
    %c0_i32_0 = arith.constant 0 : i32
    return %arg0, %c0_i32 : i32, i32
  }
}

</mosaic_0001>

<bundles_post_ra>
// kernel: _lambda_.1
= control target key start
LH: loop header
LB: loop body
LE: loop exit
PB: predicated region body
PF: predicated region fallthrough
CT: control target
= control target key end

     0   :  { %v199_v0 = vmov 0.0   ;;  %vm120_vm0 = vcmask 1040384   ;;  %v154_v55 = vlaneseq  ;;  %s246_s1 = inlined_call_operand.vmem [shape: f32[16,128], index: 1, kind: input, shape index: {}]   ;;  %s247_s0 = inlined_call_operand.vmem [shape: f32[16,128], index: 0, kind: input, shape index: {}]   ;;  %s248_s3 = inlined_call_operand.vmem [shape: f32[8,128], index: 3, kind: input, shape index: {}]   ;;  %s249_s2 = inlined_call_operand.vmem [shape: f32[8,128], index: 2, kind: input, shape index: {}]   ;;  %s250_s4 = inlined_call_operand.vmem [shape: f32[8,128], index: 4, kind: output, shape index: {}]  }
   0x1   :  { %85 = vst [vmem:[#allocation2] sm:$0x1] %v199_v0  ;;  %v88_v1 = vld [vmem:[%s246_s1] sm:$0xff]  ;;  %v89_v2 = vld [vmem:[%s246_s1 + $0x8] sm:$0xff] }
   0x2   :  { %v90_v3 = vsub.f32 1.0, %v88_v1  ;;  %189 = vlog2.f32 %v88_v1  ;;  %v91_v4 = vsub.f32 1.0, %v89_v2  ;;  %v86_v12 = vld [vmem:[%s247_s0] sm:$0xff]  ;;  %v87_v14 = vld [vmem:[%s247_s0 + $0x8] sm:$0xff]  ;;  %v155_v56 = vand.u32 127, %v154_v55 }
   0x3   :  { %191 = vlog2.f32 %v89_v2  ;;  %v133_v20 = vld [vmem:[%s248_s3] sm:$0xff] }
   0x4   :  { %193 = vlog2.f32 %v90_v3  ;;  %v134_v23 = vmul.f32 %v133_v20, %v133_v20  ;;  %v132_v29 = vld [vmem:[%s249_s2] sm:$0xff]  ;;  %vm159_vm1 = vcmp.eq.s32.totalorder %v155_v56, 2  ;;  %vm158_vm2 = vcmp.eq.s32.totalorder %v155_v56, 1 }
   0x5   :  { %195 = vlog2.f32 %v91_v4  ;;  %v135_v32 = vmul.f32 %v132_v29, %v132_v29  ;;  %vm156_vm3 = vcmp.eq.s32.totalorder %v155_v56, 0 }
   0x6   :  { %197 = vlog2.f32 %v134_v23 }
   0x7   :  { %v136_v35 = vadd.f32 %v135_v32, %v134_v23 }
   0x8   :  { %v106_v30 = vld [vmem:[#allocation2] sm:$0x1] }
   0xc   :  { %v190_v5 = vpop.eup %189 }
   0xd   :  { %v192_v6 = vpop.eup %191  ;;  %v97_v7 = vmul.f32 0.6931472, %v190_v5 }
   0xe   :  { %v194_v8 = vpop.eup %193  ;;  %v99_v9 = vmul.f32 0.6931472, %v192_v6 }
   0xf   :  { %v196_v10 = vpop.eup %195  ;;  %v93_v11 = vmul.f32 0.6931472, %v194_v8 }
  0x10   :  { %v95_v13 = vmul.f32 0.6931472, %v196_v10  ;;  %v198_v33 = vpop.eup %197 }
  0x11   :  { %v100_v15 = vsub.f32 %v97_v7, %v93_v11  ;;  %v138_v36 = vmul.f32 0.6931472, %v198_v33 }
  0x12   :  { %v101_v16 = vsub.f32 %v99_v9, %v95_v13 }
  0x13   :  { %v102_v17 = vmul.f32 %v100_v15, %v86_v12  ;;  %v139_v37 = vsub.f32 %v136_v35, %v138_v36 }
  0x14   :  { %v103_v18 = vmul.f32 %v101_v16, %v87_v14 }
  0x15   :  { %v104_v19 = vadd.f32 %v102_v17, %v93_v11  ;;  %v183_v40 = vadd.f32 -1.0, %v139_v37 }
  0x16   :  { %v105_v21 = vadd.f32 %v103_v18, %v95_v13 }
  0x18   :  { %v107_v22 = vadd.f32 %v105_v21, %v104_v19 }
  0x1a   :  { %v108_v24 = vrot.slane %v107_v22, 4 }
  0x1c   :  { %v109_v25 = vadd.f32 %v108_v24, %v107_v22 }
  0x1e   :  { %v110_v26 = vrot.slane %v109_v25, 2 }
  0x20   :  { %v111_v27 = vadd.f32 %v110_v26, %v109_v25 }
  0x22   :  { %v112_v28 = vrot.slane %v111_v27, 1 }
  0x24   :  { %v113_v31 = vadd.f32 %v112_v28, %v111_v27 }
  0x26   :  { %v114_v34 = vadd.f32 %v113_v31, %v106_v30 }
  0x28   :  { %115 = vst [vmem:[#allocation2] sm:$0x1] %v114_v34 }
  0x2f   :  { %v119_v38 = vld [vmem:[#allocation2] sm:$0x1] }
  0x30   :  { %v121_v39 = vsel %vm120_vm0, %v119_v38, 0.0 }
  0x31   :  { %122 = vadd.xlane.f32.xlu0 %v121_v39 }
  0x35   :  { %141 = vadd.xlane.f32.xlu0 %v183_v40 }
  0xbe   :  { %v123_v41 = vpop.xlane.xlu0 %122 }
  0xbf   :  { %v124_v42 = vrot.slane %v123_v41, 4 }
  0xc1   :  { %v125_v43 = vadd.f32 %v124_v42, %v123_v41 }
  0xc2   :  { %v142_v44 = vpop.xlane.xlu0 %141 }
  0xc3   :  { %v126_v45 = vrot.slane %v125_v43, 2  ;;  %v143_v46 = vrot.slane %v142_v44, 4 }
  0xc5   :  { %v144_v47 = vadd.f32 %v143_v46, %v142_v44  ;;  %v127_v48 = vadd.f32 %v126_v45, %v125_v43 }
  0xc7   :  { %v145_v49 = vrot.slane %v144_v47, 2  ;;  %v128_v50 = vrot.slane %v127_v48, 1 }
  0xc9   :  { %v146_v51 = vadd.f32 %v145_v49, %v144_v47  ;;  %v129_v52 = vadd.f32 %v128_v50, %v127_v48 }
  0xcb   :  { %184 = vpush %v129_v52  ;;  %v147_v53 = vrot.slane %v146_v51, 1 }
  0xcd   :  { %v148_v54 = vadd.f32 %v147_v53, %v146_v51 }
  0xcf   :  { %186 = vpush %v148_v54 }
  0xfc   :  { %s185_s2 = spop %184 }
  0xfd   :  { %s131_s26 = smul.f32 0.00048828125, %s185_s2 }
  0xff   :  { %v162_v58 = vstv %s131_s26 }
 0x100   :  { %s187_s3 = spop %186 }
 0x101   :  { %s150_s25 = smul.f32 0.5, %s187_s3 }
 0x103   :  { %s151_s27 = smul.f32 0.015625, %s150_s25 }
 0x105   :  { %s157_s28 = ssub.f32 %s131_s26, %s151_s27  ;;  %v160_v57 = vstv %s151_s27 }
 0x106   :  { %v161_v59 = vsel %vm159_vm1, %v160_v57, 0.0 }
 0x107   :  { %v163_v60 = vsel %vm158_vm2, %v162_v58, %v161_v59  ;;  %v164_v61 = vstv %s157_s28 }
 0x108   :  { %v165_v62 = vsel %vm156_vm3, %v164_v61, %v163_v60 }
 0x109   :  { %166 = vst [vmem:[%s250_s4] sm:$0xff] %v165_v62 }

</bundles_post_ra>
